<compile_context>
chip_gen: v7x
topology: tpu7x:2x2x1
jax: 0.10.0
libtpu: 0.0.40
codegen_flags: <defaults>
</compile_context>

<pallas_src>
import functools

import jax
import jax.numpy as jnp
import numpy as np
from jax.experimental import pallas as pl
from jax.experimental.pallas import tpu as pltpu


def _round_up(x, m):
    return ((x + m - 1) // m) * m


def _cdiv(a, b):
    return -(-a // b)


def _vmem_capacity_bytes():
    """Physical VMEM per TensorCore; conservative fallback if the query fails."""
    try:
        info = pltpu.get_tpu_info()
        cap = int(getattr(info, "vmem_capacity_bytes", 0) or 0)
        if cap > 0:
            return cap
    except Exception:
        pass
    return 64 * 1024 * 1024  # v7x per-TC size; v5e/v6e actually have 128 MiB


def _drop_loss_kernel(pred_ref, target_ref, ce_out_ref, w_out_ref, *,
                      n_valid, tile_rows, mask_rows):
    pred = pred_ref[...].astype(jnp.float32)      # (TM, C)
    target = target_ref[...].astype(jnp.float32)  # (TM, C)
    tm = pred.shape[0]

    # Row-wise max + numerically-stable logsumexp over the full (unpadded) class axis.
    pred_max = jnp.max(pred, axis=1, keepdims=True)                                   # (TM, 1)
    lse = jnp.log(jnp.sum(jnp.exp(pred - pred_max), axis=1, keepdims=True)) + pred_max

    tp = target * pred
    true_val = jnp.max(tp, axis=1, keepdims=True)                                     # (TM, 1)
    t_sum = jnp.sum(target, axis=1, keepdims=True)                                    # (TM, 1)
    sum_tp = jnp.sum(tp, axis=1, keepdims=True)                                       # (TM, 1)

    # CE with soft targets: -sum_c t*(pred - lse) = sum(t)*lse - sum(t*pred).
    ce = t_sum * lse - sum_tp                                                         # (TM, 1)

    outlier = (pred_max - true_val) > jnp.float32(0.2)
    w = jnp.float32(1.0) - outlier.astype(jnp.float32)                                # (TM, 1)

    if mask_rows:
        # Partial tail block: rows >= n_valid hold unspecified data -> zero them out.
        row = pl.program_id(0) * tile_rows + jax.lax.broadcasted_iota(jnp.int32, (tm, 1), 0)
        ok = row < n_valid
        ce = jnp.where(ok, ce, jnp.float32(0.0))
        w = jnp.where(ok, w, jnp.float32(0.0))

    ce_out_ref[...] = jnp.sum(ce, axis=0, keepdims=True)[None, :, :]   # (1, 1, 1)
    w_out_ref[...] = jnp.sum(w, axis=0, keepdims=True)[None, :, :]     # (1, 1, 1)


def drop_loss(pred, target, *, tile_rows=None):
    """pred: (N, C) logits, target: (N, C) one-hot / soft labels -> scalar f32 loss.

    Inputs may be f32 or bf16 in HBM; compute is f32 in-kernel. No host/wrapper padding.
    """
    assert pred.shape == target.shape and pred.ndim == 2
    n, c = pred.shape
    isz_p = jnp.dtype(pred.dtype).itemsize
    isz_t = jnp.dtype(target.dtype).itemsize
    sublane = {4: 8, 2: 16, 1: 32}.get(min(isz_p, isz_t), 8)

    vmem_cap = _vmem_capacity_bytes()
    # Budget for one grid step: 2 inputs x 2 pipeline buffers + ~6 live f32 (TM,C) temps.
    budget = min(int(vmem_cap * 0.55), 80 * 1024 * 1024)
    vmem_limit = min(int(vmem_cap * 0.8), 112 * 1024 * 1024)

    if tile_rows is None:
        c_acct = _round_up(c, 128)  # lane padding of the VMEM buffers
        per_row = c_acct * (2 * (isz_p + isz_t) + 24)
        tile_rows = max(sublane, budget // per_row)
    tile_rows = int(tile_rows)

    if tile_rows >= n:
        tile_rows = n  # single full-extent block (legal for any N)
    else:
        tile_rows = max(sublane, (tile_rows // sublane) * sublane)
        if tile_rows >= n:
            tile_rows = n

    num_tiles = _cdiv(n, tile_rows)
    mask_rows = (n % tile_rows) != 0

    kernel = functools.partial(
        _drop_loss_kernel, n_valid=n, tile_rows=tile_rows, mask_rows=mask_rows)

    part_shape = jax.ShapeDtypeStruct((num_tiles, 1, 1), jnp.float32)
    part_spec = pl.BlockSpec((1, 1, 1), lambda i: (i, 0, 0))

    ce_parts, w_parts = pl.pallas_call(
        kernel,
        out_shape=(part_shape, part_shape),
        grid=(num_tiles,),
        in_specs=[
            pl.BlockSpec((tile_rows, c), lambda i: (i, 0)),
            pl.BlockSpec((tile_rows, c), lambda i: (i, 0)),
        ],
        out_specs=(part_spec, part_spec),
        compiler_params=pltpu.CompilerParams(
            dimension_semantics=("parallel",),
            vmem_limit_bytes=vmem_limit,
        ),
        cost_estimate=pl.CostEstimate(
            flops=10 * n * c,
            transcendentals=n * c,
            bytes_accessed=n * c * (isz_p + isz_t) + 8 * num_tiles,
        ),
    )(pred, target)

    inv_n = jnp.float32(1.0 / n)
    return (jnp.sum(ce_parts) * inv_n) * (jnp.sum(w_parts) * inv_n)


def drop_loss_reference(pred, target):
    pred = np.asarray(pred, dtype=np.float64)
    target = np.asarray(target, dtype=np.float64)
    pred_max = np.max(pred, axis=1)
    true_val = np.max(target * pred, axis=1)
    outlier = (pred_max - true_val) > 0.2
    weights = np.ones(pred.shape[0]) - outlier * 1
    m = pred.max(axis=1, keepdims=True)
    lse = np.log(np.exp(pred - m).sum(axis=1, keepdims=True)) + m
    log_softmax = pred - lse
    ce = -(target * log_softmax).sum(axis=1)          # per-sample CE
    mean_ce = ce.mean()                               # CrossEntropyLoss(reduction='mean')
    return (mean_ce * weights).mean()


if __name__ == "__main__":
    key = jax.random.PRNGKey(0)
    k1, k2, k3, k4, k5, k6 = jax.random.split(key, 6)

    # Case 1: small one-hot classification (N=8, C=32) — single full-extent block.
    N, C = 8, 32
    pred1 = jax.random.normal(k1, (N, C), dtype=jnp.float32)
    labels = jax.random.randint(k2, (N,), 0, C)
    target1 = jax.nn.one_hot(labels, C, dtype=jnp.float32)

    loss1 = drop_loss(pred1, target1)
    jax.block_until_ready(loss1)
    ref1 = drop_loss_reference(pred1, target1)
    assert np.allclose(float(loss1), ref1, rtol=1e-4, atol=1e-5), (float(loss1), ref1)

    # Case 2: soft targets, non-128 C, multi-tile grid with a partial tail block
    # (N=300, C=200, tile_rows=64 -> 5 tiles, last one 44 valid rows), no wrapper pad.
    N2, C2 = 300, 200
    pred2 = jax.random.normal(k3, (N2, C2), dtype=jnp.float32)
    target2 = jax.nn.softmax(jax.random.normal(k4, (N2, C2), dtype=jnp.float32), axis=-1)

    loss2 = drop_loss(pred2, target2, tile_rows=64)
    jax.block_until_ready(loss2)
    ref2 = drop_loss_reference(pred2, target2)
    assert np.allclose(float(loss2), ref2, rtol=1e-4, atol=1e-5), (float(loss2), ref2)

    # Case 2b: same data with auto (byte-budget) tile sizing -> single full-extent block.
    loss2b = drop_loss(pred2, target2)
    jax.block_until_ready(loss2b)
    assert np.allclose(float(loss2b), ref2, rtol=1e-4, atol=1e-5), (float(loss2b), ref2)

    # Case 3: bf16 inputs (16-row sublane tile) with a partial tail (N=40, C=128, TM=16).
    N3, C3 = 40, 128
    pred3 = jax.random.normal(k5, (N3, C3), dtype=jnp.float32).astype(jnp.bfloat16)
    labels3 = jax.random.randint(k6, (N3,), 0, C3)
    target3 = jax.nn.one_hot(labels3, C3, dtype=jnp.bfloat16)

    loss3 = drop_loss(pred3, target3, tile_rows=16)
    jax.block_until_ready(loss3)
    ref3 = drop_loss_reference(pred3.astype(jnp.float32), target3.astype(jnp.float32))
    assert np.allclose(float(loss3), ref3, rtol=1e-3, atol=1e-4), (float(loss3), ref3)

    print("KERNEL_OK")
</pallas_src>

<mosaic_0001>
module attributes {stable_mosaic.version = 11 : i64} {
  func.func @_drop_loss_kernel(%arg0: i32, %arg1: memref<8x32xf32, #tpu.memory_space<vmem>>, %arg2: memref<8x32xf32, #tpu.memory_space<vmem>>, %arg3: memref<1x1x1xf32, #tpu.memory_space<vmem>>, %arg4: memref<1x1x1xf32, #tpu.memory_space<vmem>>) attributes {dimension_semantics = [#tpu.dimension_semantics<parallel>], iteration_bounds = array<i64: 1>, scalar_prefetch = 0 : i64, scratch_operands = 0 : i64, tpu.core_type = #tpu.core_type<tc>, window_params = [{transform_indices = @transform_0, window_bounds = array<i64: 8, 32>}, {transform_indices = @transform_1, window_bounds = array<i64: 8, 32>}, {transform_indices = @transform_2, window_bounds = array<i64: 1, 1, 1>}, {transform_indices = @transform_3, window_bounds = array<i64: 1, 1, 1>}]} {
    %c0 = arith.constant 0 : index
    %c0_0 = arith.constant 0 : index
    %0 = vector.load %arg1[%c0, %c0_0] : memref<8x32xf32, #tpu.memory_space<vmem>>, vector<8x32xf32>
    %c0_1 = arith.constant 0 : index
    %c0_2 = arith.constant 0 : index
    %1 = vector.load %arg2[%c0_1, %c0_2] : memref<8x32xf32, #tpu.memory_space<vmem>>, vector<8x32xf32>
    %cst = arith.constant dense<0xFF800000> : vector<8xf32>
    %2 = vector.multi_reduction <maximumf>, %0, %cst [1] : vector<8x32xf32> to vector<8xf32>
    %3 = vector.shape_cast %2 : vector<8xf32> to vector<8x1xf32>
    %4 = vector.broadcast %3 : vector<8x1xf32> to vector<8x32xf32>
    %5 = arith.subf %0, %4 : vector<8x32xf32>
    %6 = math.exp %5 : vector<8x32xf32>
    %cst_3 = arith.constant dense<0.000000e+00> : vector<8xf32>
    %7 = vector.multi_reduction <add>, %6, %cst_3 [1] : vector<8x32xf32> to vector<8xf32>
    %8 = vector.shape_cast %7 : vector<8xf32> to vector<8x1xf32>
    %9 = math.log %8 : vector<8x1xf32>
    %10 = arith.addf %9, %3 : vector<8x1xf32>
    %11 = arith.mulf %1, %0 : vector<8x32xf32>
    %cst_4 = arith.constant dense<0xFF800000> : vector<8xf32>
    %12 = vector.multi_reduction <maximumf>, %11, %cst_4 [1] : vector<8x32xf32> to vector<8xf32>
    %13 = vector.shape_cast %12 : vector<8xf32> to vector<8x1xf32>
    %cst_5 = arith.constant dense<0.000000e+00> : vector<8xf32>
    %14 = vector.multi_reduction <add>, %1, %cst_5 [1] : vector<8x32xf32> to vector<8xf32>
    %15 = vector.shape_cast %14 : vector<8xf32> to vector<8x1xf32>
    %cst_6 = arith.constant dense<0.000000e+00> : vector<8xf32>
    %16 = vector.multi_reduction <add>, %11, %cst_6 [1] : vector<8x32xf32> to vector<8xf32>
    %17 = vector.shape_cast %16 : vector<8xf32> to vector<8x1xf32>
    %18 = arith.mulf %15, %10 : vector<8x1xf32>
    %19 = arith.subf %18, %17 : vector<8x1xf32>
    %20 = arith.subf %3, %13 : vector<8x1xf32>
    %cst_7 = arith.constant 2.000000e-01 : f32
    %21 = vector.broadcast %cst_7 : f32 to vector<8x1xf32>
    %22 = arith.cmpf ogt, %20, %21 : vector<8x1xf32>
    %23 = arith.extui %22 : vector<8x1xi1> to vector<8x1xi32>
    %24 = arith.sitofp %23 : vector<8x1xi32> to vector<8x1xf32>
    %cst_8 = arith.constant 1.000000e+00 : f32
    %25 = vector.broadcast %cst_8 : f32 to vector<8x1xf32>
    %26 = arith.subf %25, %24 : vector<8x1xf32>
    %cst_9 = arith.constant dense<0.000000e+00> : vector<1xf32>
    %27 = vector.multi_reduction <add>, %19, %cst_9 [0] : vector<8x1xf32> to vector<1xf32>
    %28 = vector.shape_cast %27 : vector<1xf32> to vector<1x1xf32>
    %29 = vector.shape_cast %28 : vector<1x1xf32> to vector<1x1x1xf32>
    %c0_10 = arith.constant 0 : index
    %c0_11 = arith.constant 0 : index
    %c0_12 = arith.constant 0 : index
    %30 = vector.load %arg3[%c0_10, %c0_11, %c0_12] : memref<1x1x1xf32, #tpu.memory_space<vmem>>, vector<1x1x1xf32>
    tpu.vector_store %arg3[%c0_10, %c0_11, %c0_12], %29 {strides = array<i32>} : memref<1x1x1xf32, #tpu.memory_space<vmem>>, vector<1x1x1xf32>,
    %cst_13 = arith.constant dense<0.000000e+00> : vector<1xf32>
    %31 = vector.multi_reduction <add>, %26, %cst_13 [0] : vector<8x1xf32> to vector<1xf32>
    %32 = vector.shape_cast %31 : vector<1xf32> to vector<1x1xf32>
    %33 = vector.shape_cast %32 : vector<1x1xf32> to vector<1x1x1xf32>
    %c0_14 = arith.constant 0 : index
    %c0_15 = arith.constant 0 : index
    %c0_16 = arith.constant 0 : index
    %34 = vector.load %arg4[%c0_14, %c0_15, %c0_16] : memref<1x1x1xf32, #tpu.memory_space<vmem>>, vector<1x1x1xf32>
    tpu.vector_store %arg4[%c0_14, %c0_15, %c0_16], %33 {strides = array<i32>} : memref<1x1x1xf32, #tpu.memory_space<vmem>>, vector<1x1x1xf32>,
    return
  }
  func.func @transform_0(%arg0: i32) -> (i32, i32) {
    %c0_i32 = arith.constant 0 : i32
    %c0_i32_0 = arith.constant 0 : i32
    return %arg0, %c0_i32 : i32, i32
  }
  func.func @transform_1(%arg0: i32) -> (i32, i32) {
    %c0_i32 = arith.constant 0 : i32
    %c0_i32_0 = arith.constant 0 : i32
    return %arg0, %c0_i32 : i32, i32
  }
  func.func @transform_2(%arg0: i32) -> (i32, i32, i32) {
    %c0_i32 = arith.constant 0 : i32
    %c0_i32_0 = arith.constant 0 : i32
    %c0_i32_1 = arith.constant 0 : i32
    return %arg0, %c0_i32, %c0_i32_0 : i32, i32, i32
  }
  func.func @transform_3(%arg0: i32) -> (i32, i32, i32) {
    %c0_i32 = arith.constant 0 : i32
    %c0_i32_0 = arith.constant 0 : i32
    %c0_i32_1 = arith.constant 0 : i32
    return %arg0, %c0_i32, %c0_i32_0 : i32, i32, i32
  }
}

</mosaic_0001>

<bundles_post_ra>
// kernel: tpu_custom_call.1
= control target key start
LH: loop header
LB: loop body
LE: loop exit
PB: predicated region body
PF: predicated region fallthrough
CT: control target
= control target key end

     0   :  { %9 = vsyncpa [#allocation3], 0  ;;  %s302_s0 = inlined_call_operand.hbm [shape: f32[8,32], index: 0, kind: input, shape index: {}]   ;;  %s303_s1 = inlined_call_operand.hbm [shape: f32[8,32], index: 1, kind: input, shape index: {}]   ;;  %s304_s2 = inlined_call_operand.hbm [shape: f32[1,1,1], index: 2, kind: output, shape index: {0}]   ;;  %s305_s3 = inlined_call_operand.hbm [shape: f32[1,1,1], index: 3, kind: output, shape index: {1}]  }
   0x1   :  { %10 = vsyncpa [#allocation6], 0 }
   0x2   :  { %11 = vsyncpa [#allocation4], 0 }
   0x3   :  { %12 = vsyncpa [#allocation9], 0  ;;  %s222_s12 = smov [#allocation2]   ;;  %s223_s14 = smov [#allocation5]  }
   0x4   :  { %s19_s13 = sshll.u32 %s222_s12, 4  ;;  %s29_s15 = sshll.u32 %s223_s14, 4  ;;  %s20_s13 = int_to_ptr.vmem [resolvable:$true] %s19_s13  ;;  %s30_s15 = int_to_ptr.vmem [resolvable:$true] %s29_s15 }
   0x5   :  { %s126_s18 = scalar_lea.hbm %s302_s0, 128 }
   0x6   :  { %p127_p0 = scmp.ne.s32.totalorder %s302_s0, %s126_s18  ;;  %p130_p1 = scmp.lt.u32.totalorder %s126_s18, %s302_s0 }
   0x8   :  { %p132_p2 = pnand %p130_p1, %p127_p0 }
   0xa   :  { %135 = shalt.err (!%p132_p2)
}
   0xb   :  { %s136_s23 = scalar_lea.vmem %s20_s13, 128  ;;  %p141_p4 = scmp.lt.s32.totalorder %s20_s13, %s20_s13 }
   0xc   :  { %p137_p3 = scmp.ne.s32.totalorder %s20_s13, %s136_s23  ;;  %p142_p5 = scmp.lt.s32.totalorder %s136_s23, %s136_s23 }
   0xe   :  { %p143_p6 = por %p142_p5, %p141_p4 }
  0x10   :  { %p144_p7 = pnand %p143_p6, %p137_p3 }
  0x12   :  { %147 = shalt.err (!%p144_p7)
}
  0x13   :  { %22 = dma.hbm_to_vmem [thread:$0]  %s302_s0, 128, %s20_s13, [#allocation3]  }
  0x14   :  { %s148_s28 = scalar_lea.hbm %s303_s1, 128 }
  0x15   :  { %p149_p8 = scmp.ne.s32.totalorder %s303_s1, %s148_s28  ;;  %p152_p9 = scmp.lt.u32.totalorder %s148_s28, %s303_s1 }
  0x17   :  { %p154_p10 = pnand %p152_p9, %p149_p8 }
  0x19   :  { %157 = shalt.err (!%p154_p10)
}
  0x1a   :  { %s158_s6 = scalar_lea.vmem %s30_s15, 128  ;;  %p163_p12 = scmp.lt.s32.totalorder %s30_s15, %s30_s15 }
  0x1b   :  { %p159_p11 = scmp.ne.s32.totalorder %s30_s15, %s158_s6  ;;  %p164_p13 = scmp.lt.s32.totalorder %s158_s6, %s158_s6 }
  0x1d   :  { %p165_p0 = por %p164_p13, %p163_p12 }
  0x1f   :  { %p166_p1 = pnand %p165_p0, %p159_p11 }
  0x21   :  { %169 = shalt.err (!%p166_p1)
}
  0x22   :  { %32 = dma.hbm_to_vmem [thread:$0]  %s303_s1, 128, %s30_s15, [#allocation6]  }
  0x23   :  { %214 = dma.done.wait [#allocation3], 128  }
  0x24   :  { %215 = vsyncadd [#allocation3], 4294967168 }
  0x25   :  { %216 = dma.done.wait [#allocation6], 128  }
  0x26   :  { %217 = vsyncadd [#allocation6], 4294967168  ;;  %vm41_vm0 = vcmask 261120   ;;  %v39_v0 = vld [vmem:[#allocation2] sm:$0xff]  ;;  %v40_v1 = vld [vmem:[#allocation5] sm:$0xff]  ;;  %v224_v11 = vmov 0.0  }
  0x27   :  { %v42_v2 = vsel %vm41_vm0, %v39_v0, -inf  ;;  %v54_v3 = vmul.f32 %v40_v1, %v39_v0  ;;  %v58_v5 = vsel %vm41_vm0, %v40_v1, 0.0  ;;  %vm77_vm2 = vcmask 0   ;;  %s225_s1 = smov [#allocation8]  }
  0x28   :  { %43 = vmax.xlane.f32.xlu0 %v42_v2  ;;  %s102_s8 = sshll.u32 %s225_s1, 4  ;;  %s103_s8 = int_to_ptr.vmem [resolvable:$true] %s102_s8 }
  0x29   :  { %v55_v4 = vsel %vm41_vm0, %v54_v3, -inf  ;;  %v61_v21 = vsel %vm41_vm0, %v54_v3, 0.0  ;;  %s170_s9 = scalar_lea.vmem %s103_s8, 16  ;;  %s174_s10 = scalar_lea.vmem %s103_s8, 32 }
  0x2a   :  { %56 = vmax.xlane.f32.xlu1 %v55_v4  ;;  %p171_p2 = scmp.ne.s32.totalorder %s103_s8, %s170_s9  ;;  %p175_p3 = scmp.lt.s32.totalorder %s103_s8, %s103_s8 }
  0x2b   :  { %p176_p4 = scmp.lt.s32.totalorder %s174_s10, %s170_s9 }
  0x2d   :  { %p177_p5 = por %p176_p4, %p175_p3 }
  0x2e   :  { %59 = vadd.xlane.f32.xlu1 %v58_v5 }
  0x2f   :  { %p178_p6 = pnand %p177_p5, %p171_p2 }
  0xb5   :  { %v44_v6 = vpop.xlane.xlu0 %43 }
  0xb6   :  { %v45_v7 = vsub.f32 %v39_v0, %v44_v6 }
  0xb7   :  { %v57_v8 = vpop.xlane.xlu1 %56 }
  0xb8   :  { %v46_v9 = vmul.f32 1.442695, %v45_v7  ;;  %v66_v10 = vsub.f32 %v44_v6, %v57_v8 }
  0xba   :  { %122 = vpow2.f32 %v46_v9  ;;  %vm67_vm1 = vcmp.gt.f32.partialorder %v66_v10, 0.2 }
  0xbb   :  { %v116_v12 = vsel %vm67_vm1, 1.0, %v224_v11 }
  0xbc   :  { %v70_v13 = vsub.f32 1.0, %v116_v12 }
  0xbe   :  { %v79_v14 = vrot.slane %v70_v13, 4 }
  0xc0   :  { %v80_v15 = vadd.f32 %v79_v14, %v70_v13 }
  0xc2   :  { %v81_v16 = vrot.slane %v80_v15, 2 }
  0xc4   :  { %v123_v17 = vpop.eup %122  ;;  %v82_v18 = vadd.f32 %v81_v16, %v80_v15 }
  0xc5   :  { %v48_v19 = vsel %vm41_vm0, %v123_v17, 0.0 }
  0xc6   :  { %49 = vadd.xlane.f32.xlu0 %v48_v19  ;;  %v83_v20 = vrot.slane %v82_v18, 1 }
  0xc8   :  { %v84_v22 = vadd.f32 %v83_v20, %v82_v18 }
  0xca   :  { %62 = vadd.xlane.f32.xlu0 %v61_v21  ;;  %85 = vst.msk [vmem:[#allocation8] sm:$0x1] %vm77_vm2, %v84_v22 }
  0xcb   :  { %181 = shalt.err (!%p178_p6)
}
  0xcc   :  { %s182_s13 = scalar_lea.hbm %s305_s3, 16 }
  0xcd   :  { %p183_p7 = scmp.ne.s32.totalorder %s305_s3, %s182_s13  ;;  %p186_p8 = scmp.lt.u32.totalorder %s182_s13, %s305_s3 }
  0xcf   :  { %p188_p9 = pnand %p186_p8, %p183_p7 }
  0xd1   :  { %191 = shalt.err (!%p188_p9)
}
  0xd2   :  { %105 = dma.vmem_to_hbm [thread:$0]  %s103_s8, 16, %s305_s3, [#allocation9]   ;;  %v60_v26 = vpop.xlane.xlu1 %59 }
  0xd3   :  { %s226_s20 = smov [#allocation7]  }
  0xd4   :  { %s92_s21 = sshll.u32 %s226_s20, 4  ;;  %s93_s21 = int_to_ptr.vmem [resolvable:$true] %s92_s21 }
  0xd5   :  { %s192_s3 = scalar_lea.vmem %s93_s21, 16  ;;  %s196_s22 = scalar_lea.vmem %s93_s21, 32 }
  0xd6   :  { %p193_p10 = scmp.ne.s32.totalorder %s93_s21, %s192_s3  ;;  %p197_p11 = scmp.lt.s32.totalorder %s93_s21, %s93_s21 }
  0xd7   :  { %p198_p12 = scmp.lt.s32.totalorder %s196_s22, %s192_s3 }
  0xd9   :  { %p199_p13 = por %p198_p12, %p197_p11 }
  0xdb   :  { %p200_p0 = pnand %p199_p13, %p193_p10 }
 0x153   :  { %v50_v23 = vpop.xlane.xlu0 %49 }
 0x154   :  { %124 = vlog2.f32 %v50_v23 }
 0x157   :  { %v63_v28 = vpop.xlane.xlu0 %62 }
 0x15e   :  { %v125_v24 = vpop.eup %124 }
 0x15f   :  { %v52_v25 = vmul.f32 0.6931472, %v125_v24 }
 0x161   :  { %v53_v27 = vadd.f32 %v52_v25, %v44_v6 }
 0x163   :  { %v64_v29 = vmul.f32 %v60_v26, %v53_v27 }
 0x165   :  { %v65_v30 = vsub.f32 %v64_v29, %v63_v28 }
 0x167   :  { %v71_v31 = vrot.slane %v65_v30, 4 }
 0x169   :  { %v72_v32 = vadd.f32 %v71_v31, %v65_v30 }
 0x16b   :  { %v73_v33 = vrot.slane %v72_v32, 2 }
 0x16d   :  { %v74_v34 = vadd.f32 %v73_v33, %v72_v32 }
 0x16f   :  { %v75_v35 = vrot.slane %v74_v34, 1 }
 0x171   :  { %v76_v36 = vadd.f32 %v75_v35, %v74_v34 }
 0x173   :  { %78 = vst.msk [vmem:[#allocation7] sm:$0x1] %vm77_vm2, %v76_v36 }
 0x174   :  { %203 = shalt.err (!%p200_p0)
}
 0x175   :  { %s204_s25 = scalar_lea.hbm %s304_s2, 16 }
 0x176   :  { %p205_p1 = scmp.ne.s32.totalorder %s304_s2, %s204_s25  ;;  %p208_p2 = scmp.lt.u32.totalorder %s204_s25, %s304_s2 }
 0x178   :  { %p210_p3 = pnand %p208_p2, %p205_p1 }
 0x17a   :  { %213 = shalt.err (!%p210_p3)
}
 0x17b   :  { %95 = dma.vmem_to_hbm [thread:$0]  %s93_s21, 16, %s304_s2, [#allocation4]  }
 0x17c   :  { %218 = dma.done.wait [#allocation4], 16  }
 0x17d   :  { %219 = vsyncadd [#allocation4], 4294967280 }
 0x17e   :  { %220 = dma.done.wait [#allocation9], 16  }
 0x17f   :  { %221 = vsyncadd [#allocation9], 4294967280 }
 0x180   :  { %112 = vsyncpa [#allocation3], 1 }
 0x181   :  { %113 = vsyncpa [#allocation6], 1 }
 0x182   :  { %114 = vsyncpa [#allocation4], 1 }
 0x183   :  { %115 = vsyncpa [#allocation9], 1 }

</bundles_post_ra>
